<compile_context>
chip_gen: v7x
topology: tpu7x:2x2x1
jax: 0.10.0
libtpu: 0.0.40
codegen_flags: <defaults>
</compile_context>

<pallas_src>
import functools

import jax
import jax.numpy as jnp
from jax.experimental import pallas as pl
from jax.experimental.pallas import tpu as pltpu

LANE = 128
SUBLANE = 8


def _round_up(x: int, m: int) -> int:
    return ((x + m - 1) // m) * m


# ---------------------------------------------------------------------------
# Fused kernel: x -> Linear+ReLU -> ... -> Linear   (all layers in one body)
# Ref order: (x, w1, b1, w2, b2, ..., wn, bn, out)
# ---------------------------------------------------------------------------
def _fused_mlp_kernel(*refs, n_layers: int):
    x_ref, o_ref = refs[0], refs[-1]
    wb = refs[1:-1]

    h = x_ref[...]                                   # (bm, K) f32
    for i in range(n_layers):
        w_ref = wb[2 * i]                            # (K_i, N_i)  bf16, pre-transposed
        b_ref = wb[2 * i + 1]                        # (1, N_i)    f32
        h = jnp.dot(h.astype(w_ref.dtype), w_ref[...],
                    preferred_element_type=jnp.float32)
        h = h + b_ref[...]                           # f32 bias add
        if i < n_layers - 1:
            h = jnp.maximum(h, 0.0)                  # f32 ReLU (no bf16 VPU needed)
    o_ref[...] = h.astype(o_ref.dtype)


# ---------------------------------------------------------------------------
# One-time host-side parameter prep (free: static weights)
# ---------------------------------------------------------------------------
def prepare_mlp_params(params, *, mxu_dtype=jnp.bfloat16):
    """Transpose PyTorch-layout (out,in) weights to (in,out), cast to the MXU
    dtype, reshape biases to (1,out) f32 and pad the FINAL layer's out dim to
    a multiple of 128 lanes (zeros) for a lane-dense HBM store."""
    prepped = []
    n = len(params)
    for i, (w, b) in enumerate(params):
        wt = jnp.asarray(w, jnp.float32).T           # (in, out)
        bt = jnp.asarray(b, jnp.float32).reshape(1, -1)
        if i == n - 1:
            out = wt.shape[1]
            out_p = _round_up(out, LANE)
            if out_p != out:
                wt = jnp.pad(wt, ((0, 0), (0, out_p - out)))
                bt = jnp.pad(bt, ((0, 0), (0, out_p - out)))
        prepped.append((wt.astype(mxu_dtype), bt.astype(jnp.float32)))
    return prepped


# ---------------------------------------------------------------------------
# Wrapper: flatten, pad batch, single pallas_call, slice padding off
# ---------------------------------------------------------------------------
def mlp_forward(x, prepped_params, n_classes, *, batch_tile=512):
    assert batch_tile % SUBLANE == 0
    B = x.shape[0]
    h = x.reshape(B, -1).astype(jnp.float32)
    K = h.shape[1]
    n_layers = len(prepped_params)
    Np = prepped_params[-1][0].shape[1]              # lane-padded classes

    # Pad batch to a full sublane group; tile it only if it gets large.
    Bp = _round_up(B, SUBLANE)
    if Bp > batch_tile:
        bm = batch_tile
        Bp = _round_up(Bp, bm)
    else:
        bm = Bp
    if Bp != B:
        h = jnp.pad(h, ((0, Bp - B), (0, 0)))
    grid = (Bp // bm,)

    in_specs = [pl.BlockSpec((bm, K), lambda i: (i, 0))]
    flat_inputs = [h]
    for w, b in prepped_params:
        in_specs.append(pl.BlockSpec(w.shape, lambda i: (0, 0)))
        in_specs.append(pl.BlockSpec(b.shape, lambda i: (0, 0)))
        flat_inputs += [w, b]
    out_specs = pl.BlockSpec((bm, Np), lambda i: (i, 0))

    # Advisory cost estimate for XLA's scheduler.
    flops = 0
    bytes_accessed = h.size * h.dtype.itemsize + Bp * Np * 4
    for w, b in prepped_params:
        flops += 2 * Bp * w.shape[0] * w.shape[1] + Bp * w.shape[1]
        bytes_accessed += w.size * w.dtype.itemsize + b.size * b.dtype.itemsize

    kernel = functools.partial(_fused_mlp_kernel, n_layers=n_layers)
    out = pl.pallas_call(
        kernel,
        out_shape=jax.ShapeDtypeStruct((Bp, Np), jnp.float32),
        grid=grid,
        in_specs=in_specs,
        out_specs=out_specs,
        compiler_params=pltpu.CompilerParams(
            dimension_semantics=("parallel",)),
        cost_estimate=pl.CostEstimate(
            flops=flops, transcendentals=0, bytes_accessed=bytes_accessed),
    )(*flat_inputs)

    return out[:B, :n_classes]


# ---------------------------------------------------------------------------
# Deterministic PyTorch-nn.Linear-style init (uniform +-1/sqrt(fan_in))
# ---------------------------------------------------------------------------
def init_mlp_params(key, fc_sizes):
    sizes = list(fc_sizes)
    n_classes = sizes.pop()
    dims = sizes + [n_classes]                       # [in0, h1, ..., n_classes]
    params = []
    for fan_in, fan_out in zip(dims[:-1], dims[1:]):
        key, kw, kb = jax.random.split(key, 3)
        bound = 1.0 / jnp.sqrt(jnp.float32(fan_in))
        w = jax.random.uniform(kw, (fan_out, fan_in), jnp.float32, -bound, bound)
        b = jax.random.uniform(kb, (fan_out,), jnp.float32, -bound, bound)
        params.append((w, b))
    return params


if __name__ == "__main__":
    key = jax.random.PRNGKey(0)
    kx, kp = jax.random.split(key)

    # Input consistent with flatten(start_dim=1): (B=2, C=4, H=16, W=16) -> 1024 feats
    x = jax.random.normal(kx, (2, 4, 16, 16), jnp.float32)

    # MLP(1024, 32, 16, 10): Linear(1024,32)+ReLU, Linear(32,16)+ReLU, Linear(16,10)
    fc_sizes = (1024, 32, 16, 10)
    params = init_mlp_params(kp, fc_sizes)
    n_classes = fc_sizes[-1]

    prepped = prepare_mlp_params(params, mxu_dtype=jnp.bfloat16)

    fwd = jax.jit(lambda xx: mlp_forward(xx, prepped, n_classes))
    out = fwd(x)
    jax.block_until_ready(out)

    # --- reference mirroring the kernel numerics (bf16 MXU inputs, f32 accumulate)
    h = x.reshape(x.shape[0], -1)
    for i, (w, b) in enumerate(params):
        hq = h.astype(jnp.bfloat16).astype(jnp.float32)
        wq = w.astype(jnp.bfloat16).astype(jnp.float32)
        h = hq @ wq.T + b
        if i < len(params) - 1:
            h = jnp.maximum(h, 0.0)
    ref_bf16 = h

    # --- pure-f32 reference (original PyTorch semantics), loose tolerance
    h = x.reshape(x.shape[0], -1)
    for i, (w, b) in enumerate(params):
        h = h @ w.T + b
        if i < len(params) - 1:
            h = jnp.maximum(h, 0.0)
    ref_f32 = h

    assert out.shape == (2, n_classes), out.shape
    assert jnp.allclose(out, ref_bf16, atol=2e-4, rtol=2e-4), float(
        jnp.max(jnp.abs(out - ref_bf16)))
    assert jnp.allclose(out, ref_f32, atol=5e-2, rtol=5e-2), float(
        jnp.max(jnp.abs(out - ref_f32)))

    print("KERNEL_OK")
</pallas_src>

<mosaic_0001>
module attributes {stable_mosaic.version = 11 : i64} {
  func.func @_fused_mlp_kernel(%arg0: i32, %arg1: memref<8x1024xf32, #tpu.memory_space<vmem>>, %arg2: memref<1024x32xbf16, #tpu.memory_space<vmem>>, %arg3: memref<1x32xf32, #tpu.memory_space<vmem>>, %arg4: memref<32x16xbf16, #tpu.memory_space<vmem>>, %arg5: memref<1x16xf32, #tpu.memory_space<vmem>>, %arg6: memref<16x128xbf16, #tpu.memory_space<vmem>>, %arg7: memref<1x128xf32, #tpu.memory_space<vmem>>, %arg8: memref<8x128xf32, #tpu.memory_space<vmem>>) attributes {dimension_semantics = [#tpu.dimension_semantics<parallel>], iteration_bounds = array<i64: 1>, scalar_prefetch = 0 : i64, scratch_operands = 0 : i64, tpu.core_type = #tpu.core_type<tc>, window_params = [{transform_indices = @transform_0, window_bounds = array<i64: 8, 1024>}, {pipeline_mode = #tpu.pipeline_mode<synchronous>, transform_indices = @transform_1, window_bounds = array<i64: 1024, 32>}, {pipeline_mode = #tpu.pipeline_mode<synchronous>, transform_indices = @transform_2, window_bounds = array<i64: 1, 32>}, {pipeline_mode = #tpu.pipeline_mode<synchronous>, transform_indices = @transform_3, window_bounds = array<i64: 32, 16>}, {pipeline_mode = #tpu.pipeline_mode<synchronous>, transform_indices = @transform_4, window_bounds = array<i64: 1, 16>}, {pipeline_mode = #tpu.pipeline_mode<synchronous>, transform_indices = @transform_5, window_bounds = array<i64: 16, 128>}, {pipeline_mode = #tpu.pipeline_mode<synchronous>, transform_indices = @transform_6, window_bounds = array<i64: 1, 128>}, {transform_indices = @transform_7, window_bounds = array<i64: 8, 128>}]} {
    %c0 = arith.constant 0 : index
    %c0_0 = arith.constant 0 : index
    %0 = vector.load %arg1[%c0, %c0_0] : memref<8x1024xf32, #tpu.memory_space<vmem>>, vector<8x1024xf32>
    %1 = arith.truncf %0 : vector<8x1024xf32> to vector<8x1024xbf16>
    %c0_1 = arith.constant 0 : index
    %c0_2 = arith.constant 0 : index
    %2 = vector.load %arg2[%c0_1, %c0_2] : memref<1024x32xbf16, #tpu.memory_space<vmem>>, vector<1024x32xbf16>
    %cst = arith.constant dense<0.000000e+00> : vector<8x32xf32>
    %3 = tpu.matmul %1, %2, %cst {dimension_numbers = #tpu.dot_dimension_numbers<[1], [0], [0], [1], [0, 0, 1, 1], [], []>} : vector<8x1024xbf16>, vector<1024x32xbf16>, vector<8x32xf32> -> vector<8x32xf32>
    %c0_3 = arith.constant 0 : index
    %c0_4 = arith.constant 0 : index
    %4 = vector.load %arg3[%c0_3, %c0_4] : memref<1x32xf32, #tpu.memory_space<vmem>>, vector<1x32xf32>
    %5 = vector.broadcast %4 : vector<1x32xf32> to vector<8x32xf32>
    %6 = arith.addf %3, %5 : vector<8x32xf32>
    %cst_5 = arith.constant 0.000000e+00 : f32
    %7 = vector.broadcast %cst_5 : f32 to vector<8x32xf32>
    %8 = arith.maximumf %6, %7 : vector<8x32xf32>
    %9 = arith.truncf %8 : vector<8x32xf32> to vector<8x32xbf16>
    %c0_6 = arith.constant 0 : index
    %c0_7 = arith.constant 0 : index
    %10 = vector.load %arg4[%c0_6, %c0_7] : memref<32x16xbf16, #tpu.memory_space<vmem>>, vector<32x16xbf16>
    %cst_8 = arith.constant dense<0.000000e+00> : vector<8x16xf32>
    %11 = tpu.matmul %9, %10, %cst_8 {dimension_numbers = #tpu.dot_dimension_numbers<[1], [0], [0], [1], [0, 0, 1, 1], [], []>} : vector<8x32xbf16>, vector<32x16xbf16>, vector<8x16xf32> -> vector<8x16xf32>
    %c0_9 = arith.constant 0 : index
    %c0_10 = arith.constant 0 : index
    %12 = vector.load %arg5[%c0_9, %c0_10] : memref<1x16xf32, #tpu.memory_space<vmem>>, vector<1x16xf32>
    %13 = vector.broadcast %12 : vector<1x16xf32> to vector<8x16xf32>
    %14 = arith.addf %11, %13 : vector<8x16xf32>
    %cst_11 = arith.constant 0.000000e+00 : f32
    %15 = vector.broadcast %cst_11 : f32 to vector<8x16xf32>
    %16 = arith.maximumf %14, %15 : vector<8x16xf32>
    %17 = arith.truncf %16 : vector<8x16xf32> to vector<8x16xbf16>
    %c0_12 = arith.constant 0 : index
    %c0_13 = arith.constant 0 : index
    %18 = vector.load %arg6[%c0_12, %c0_13] : memref<16x128xbf16, #tpu.memory_space<vmem>>, vector<16x128xbf16>
    %cst_14 = arith.constant dense<0.000000e+00> : vector<8x128xf32>
    %19 = tpu.matmul %17, %18, %cst_14 {dimension_numbers = #tpu.dot_dimension_numbers<[1], [0], [0], [1], [0, 0, 1, 1], [], []>} : vector<8x16xbf16>, vector<16x128xbf16>, vector<8x128xf32> -> vector<8x128xf32>
    %c0_15 = arith.constant 0 : index
    %c0_16 = arith.constant 0 : index
    %20 = vector.load %arg7[%c0_15, %c0_16] : memref<1x128xf32, #tpu.memory_space<vmem>>, vector<1x128xf32>
    %21 = vector.broadcast %20 : vector<1x128xf32> to vector<8x128xf32>
    %22 = arith.addf %19, %21 : vector<8x128xf32>
    %c0_17 = arith.constant 0 : index
    %c0_18 = arith.constant 0 : index
    %23 = vector.load %arg8[%c0_17, %c0_18] : memref<8x128xf32, #tpu.memory_space<vmem>>, vector<8x128xf32>
    tpu.vector_store %arg8[%c0_17, %c0_18], %22 {strides = array<i32>} : memref<8x128xf32, #tpu.memory_space<vmem>>, vector<8x128xf32>,
    return
  }
  func.func @transform_0(%arg0: i32) -> (i32, i32) {
    %c0_i32 = arith.constant 0 : i32
    %c0_i32_0 = arith.constant 0 : i32
    return %arg0, %c0_i32 : i32, i32
  }
  func.func @transform_1(%arg0: i32) -> (i32, i32) {
    %c0_i32 = arith.constant 0 : i32
    %c0_i32_0 = arith.constant 0 : i32
    %c0_i32_1 = arith.constant 0 : i32
    return %c0_i32, %c0_i32_0 : i32, i32
  }
  func.func @transform_2(%arg0: i32) -> (i32, i32) {
    %c0_i32 = arith.constant 0 : i32
    %c0_i32_0 = arith.constant 0 : i32
    %c0_i32_1 = arith.constant 0 : i32
    return %c0_i32, %c0_i32_0 : i32, i32
  }
  func.func @transform_3(%arg0: i32) -> (i32, i32) {
    %c0_i32 = arith.constant 0 : i32
    %c0_i32_0 = arith.constant 0 : i32
    %c0_i32_1 = arith.constant 0 : i32
    return %c0_i32, %c0_i32_0 : i32, i32
  }
  func.func @transform_4(%arg0: i32) -> (i32, i32) {
    %c0_i32 = arith.constant 0 : i32
    %c0_i32_0 = arith.constant 0 : i32
    %c0_i32_1 = arith.constant 0 : i32
    return %c0_i32, %c0_i32_0 : i32, i32
  }
  func.func @transform_5(%arg0: i32) -> (i32, i32) {
    %c0_i32 = arith.constant 0 : i32
    %c0_i32_0 = arith.constant 0 : i32
    %c0_i32_1 = arith.constant 0 : i32
    return %c0_i32, %c0_i32_0 : i32, i32
  }
  func.func @transform_6(%arg0: i32) -> (i32, i32) {
    %c0_i32 = arith.constant 0 : i32
    %c0_i32_0 = arith.constant 0 : i32
    %c0_i32_1 = arith.constant 0 : i32
    return %c0_i32, %c0_i32_0 : i32, i32
  }
  func.func @transform_7(%arg0: i32) -> (i32, i32) {
    %c0_i32 = arith.constant 0 : i32
    %c0_i32_0 = arith.constant 0 : i32
    return %arg0, %c0_i32 : i32, i32
  }
}

</mosaic_0001>

<bundles_post_ra>
// kernel: _lambda_.1
= control target key start
LH: loop header
LB: loop body
LE: loop exit
PB: predicated region body
PF: predicated region fallthrough
CT: control target
= control target key end

     0   :  { %12 = vsyncpa [#allocation3], 0  ;;  %s1147_s24 = smov [#allocation2]   ;;  %s1249_s0 = inlined_call_operand.vmem [shape: f32[8,1024], index: 0, kind: input, shape index: {}]   ;;  %s1250_s1 = inlined_call_operand.hbm [shape: bf16[1024,32], index: 1, kind: input, shape index: {}]   ;;  %s1251_s2 = inlined_call_operand.vmem [shape: f32[1,32], index: 2, kind: input, shape index: {}]   ;;  %s1252_s3 = inlined_call_operand.vmem [shape: bf16[32,16], index: 3, kind: input, shape index: {}]   ;;  %s1253_s4 = inlined_call_operand.vmem [shape: f32[1,16], index: 4, kind: input, shape index: {}]   ;;  %s1254_s5 = inlined_call_operand.vmem [shape: bf16[16,128], index: 5, kind: input, shape index: {}]   ;;  %s1255_s6 = inlined_call_operand.vmem [shape: f32[1,128], index: 6, kind: input, shape index: {}]   ;;  %s1256_s7 = inlined_call_operand.vmem [shape: f32[8,128], index: 7, kind: output, shape index: {}]  }
   0x1   :  { %s20_s25 = sshll.u32 %s1147_s24, 4  ;;  %s1123_s28 = scalar_lea.hbm %s1250_s1, 8192  ;;  %s21_s25 = int_to_ptr.vmem [resolvable:$true] %s20_s25 }
   0x2   :  { %p1124_p0 = scmp.ne.s32.totalorder %s1250_s1, %s1123_s28  ;;  %p1127_p1 = scmp.lt.u32.totalorder %s1123_s28, %s1250_s1 }
   0x4   :  { %p1129_p2 = pnand %p1127_p1, %p1124_p0 }
   0x6   :  { %1132 = shalt.err (!%p1129_p2)
}
   0x7   :  { %s1133_s10 = scalar_lea.vmem %s21_s25, 8192  ;;  %p1138_p4 = scmp.lt.s32.totalorder %s21_s25, %s21_s25 }
   0x8   :  { %p1134_p3 = scmp.ne.s32.totalorder %s21_s25, %s1133_s10  ;;  %p1139_p5 = scmp.lt.s32.totalorder %s1133_s10, %s1133_s10 }
   0xa   :  { %p1140_p6 = por %p1139_p5, %p1138_p4 }
   0xc   :  { %p1141_p7 = pnand %p1140_p6, %p1134_p3 }
   0xe   :  { %1144 = shalt.err (!%p1141_p7)
}
   0xf   :  { %s1148_s11 = smov 64   ;;  %s1149_s12 = smov 4  }
  0x10   :  { %26 = dma.hbm_to_vmem [thread:$0]  %s1250_s1, 8192, %s21_s25, [#allocation3], %s1148_s11, %s1148_s11, %s1149_s12  }
  0x11   :  { %1145 = dma.done.wait [#allocation3], 8192  }
  0x12   :  { %1146 = vsyncadd [#allocation3], 4294959104  ;;  %v1056_v0 = vld [vmem:[#allocation2 + $0x40] sm:$0xff]   ;;  %v1060_v4 = vld [vmem:[#allocation2 + $0x48] sm:$0xff]   ;;  %vm1151_vm0 = vmmov 0   ;;  %vm761_vm1 = vcmask 261120  }
  0x13   :  { %v1057_v1 = vld [vmem:[#allocation2 + $0xc0] sm:$0xff]   ;;  %944 = vmatprep.subr.bf16.mxu0 %v1056_v0  ;;  %v1061_v5 = vld [vmem:[#allocation2 + $0xc8] sm:$0xff]   ;;  %v1064_v8 = vld [vmem:[#allocation2 + $0x50] sm:$0xff]   ;;  %vm822_vm2 = vcmask 130048  }
  0x14   :  { %v1058_v2 = vld [vmem:[#allocation2] sm:$0xff]   ;;  %966 = vmatprep.subr.bf16.mxu1 %v1057_v1  ;;  %v1062_v6 = vld [vmem:[#allocation2 + $0x8] sm:$0xff]   ;;  %v1065_v9 = vld [vmem:[#allocation2 + $0xd0] sm:$0xff]  }
  0x15   :  { %v1059_v3 = vld [vmem:[#allocation2 + $0x80] sm:$0xff]   ;;  %945 = vmatpush3.bf16.msra.mxu0 %v1058_v2  ;;  %v1063_v7 = vld [vmem:[#allocation2 + $0x88] sm:$0xff]   ;;  %v1066_v10 = vld [vmem:[#allocation2 + $0x10] sm:$0xff]  }
  0x16   :  { %967 = vmatpush3.bf16.msra.mxu1 %v1059_v3  ;;  %946 = vmatprep.subr.bf16.mxu0 %v1060_v4  ;;  %v1067_v11 = vld [vmem:[#allocation2 + $0x90] sm:$0xff]   ;;  %v1068_v12 = vld [vmem:[#allocation2 + $0x58] sm:$0xff]   ;;  %v1072_v16 = vld [vmem:[#allocation2 + $0x60] sm:$0xff]  }
  0x17   :  { %968 = vmatprep.subr.bf16.mxu1 %v1061_v5  ;;  %v1069_v13 = vld [vmem:[#allocation2 + $0xd8] sm:$0xff]   ;;  %v1073_v17 = vld [vmem:[#allocation2 + $0xe0] sm:$0xff]   ;;  %v1076_v20 = vld [vmem:[#allocation2 + $0x68] sm:$0xff]  }
  0x18   :  { %v1070_v14 = vld [vmem:[#allocation2 + $0x18] sm:$0xff]   ;;  %v1074_v18 = vld [vmem:[#allocation2 + $0x20] sm:$0xff]   ;;  %v1077_v21 = vld [vmem:[#allocation2 + $0xe8] sm:$0xff]  }
  0x19   :  { %947 = vmatpush3.bf16.msra.mxu0 %v1062_v6  ;;  %v1071_v15 = vld [vmem:[#allocation2 + $0x98] sm:$0xff]   ;;  %v1075_v19 = vld [vmem:[#allocation2 + $0xa0] sm:$0xff]   ;;  %v1078_v22 = vld [vmem:[#allocation2 + $0x28] sm:$0xff]  }
  0x1a   :  { %969 = vmatpush3.bf16.msra.mxu1 %v1063_v7  ;;  %948 = vmatprep.subr.bf16.mxu0 %v1064_v8  ;;  %v1079_v23 = vld [vmem:[#allocation2 + $0xa8] sm:$0xff]   ;;  %v1080_v24 = vld [vmem:[#allocation2 + $0x70] sm:$0xff]   ;;  %v1084_v28 = vld [vmem:[#allocation2 + $0x78] sm:$0xff]  }
  0x1b   :  { %970 = vmatprep.subr.bf16.mxu1 %v1065_v9  ;;  %v1081_v25 = vld [vmem:[#allocation2 + $0xf0] sm:$0xff]   ;;  %v1085_v29 = vld [vmem:[#allocation2 + $0xf8] sm:$0xff]   ;;  %v42_v32 = vld [vmem:[%s1249_s0 + $0x8] sm:$0xff] }
  0x1c   :  { %v1082_v26 = vld [vmem:[#allocation2 + $0x30] sm:$0xff]   ;;  %v1086_v30 = vld [vmem:[#allocation2 + $0x38] sm:$0xff]   ;;  %v41_v34 = vld [vmem:[%s1249_s0] sm:$0xff]  ;;  %v50_v35 = vpack.c.bf16 %v42_v32, %v42_v32 }
  0x1d   :  { %949 = vmatpush3.bf16.msra.mxu0 %v1066_v10  ;;  %v1083_v27 = vld [vmem:[#allocation2 + $0xb0] sm:$0xff]   ;;  %v1087_v31 = vld [vmem:[#allocation2 + $0xb8] sm:$0xff]   ;;  %v49_v37 = vpack.c.bf16 %v41_v34, %v41_v34  ;;  %v1088_v40 = vld [vmem:[#allocation2 + $0x140] sm:$0xff]  }
  0x1e   :  { %971 = vmatpush3.bf16.msra.mxu1 %v1067_v11  ;;  %950 = vmatprep.subr.bf16.mxu0 %v1068_v12  ;;  %v44_v33 = vld [vmem:[%s1249_s0 + $0x18] sm:$0xff]  ;;  %v43_v38 = vld [vmem:[%s1249_s0 + $0x10] sm:$0xff]  ;;  %v1089_v41 = vld [vmem:[#allocation2 + $0x1c0] sm:$0xff]  }
  0x1f   :  { %972 = vmatprep.subr.bf16.mxu1 %v1069_v13  ;;  %v52_v36 = vpack.c.bf16 %v44_v33, %v44_v33  ;;  %v51_v39 = vpack.c.bf16 %v43_v38, %v43_v38  ;;  %608 = vmatprep.mubr.bf16.mxu0 %v50_v35  ;;  %v1090_v42 = vld [vmem:[#allocation2 + $0x100] sm:$0xff]   ;;  %v1092_v44 = vld [vmem:[#allocation2 + $0x148] sm:$0xff]   ;;  %v1096_v48 = vld [vmem:[#allocation2 + $0x150] sm:$0xff]  }
  0x20   :  { %v1091_v43 = vld [vmem:[#allocation2 + $0x180] sm:$0xff]   ;;  %v1093_v45 = vld [vmem:[#allocation2 + $0x1c8] sm:$0xff]   ;;  %v1097_v49 = vld [vmem:[#allocation2 + $0x1d0] sm:$0xff]  }
  0x21   :  { %951 = vmatpush3.bf16.msra.mxu0 %v1070_v14  ;;  %648 = vmatprep.mubr.bf16.mxu1 %v52_v36  ;;  %v1094_v46 = vld [vmem:[#allocation2 + $0x108] sm:$0xff]   ;;  %v1098_v50 = vld [vmem:[#allocation2 + $0x110] sm:$0xff]   ;;  %v1100_v52 = vld [vmem:[#allocation2 + $0x158] sm:$0xff]  }
  0x22   :  { %973 = vmatpush3.bf16.msra.mxu1 %v1071_v15  ;;  %952 = vmatprep.subr.bf16.mxu0 %v1072_v16  ;;  %v1095_v47 = vld [vmem:[#allocation2 + $0x188] sm:$0xff]   ;;  %v1099_v51 = vld [vmem:[#allocation2 + $0x190] sm:$0xff]   ;;  %v1101_v53 = vld [vmem:[#allocation2 + $0x1d8] sm:$0xff]  }
  0x23   :  { %974 = vmatprep.subr.bf16.mxu1 %v1073_v17  ;;  %v1102_v54 = vld [vmem:[#allocation2 + $0x118] sm:$0xff]   ;;  %v1104_v56 = vld [vmem:[#allocation2 + $0x160] sm:$0xff]   ;;  %v1108_v60 = vld [vmem:[#allocation2 + $0x168] sm:$0xff]   ;;  %v1150_v17 = vmov 0.0  }
  0x24   :  { %v1103_v55 = vld [vmem:[#allocation2 + $0x198] sm:$0xff]   ;;  %v1105_v57 = vld [vmem:[#allocation2 + $0x1e0] sm:$0xff]   ;;  %v1109_v61 = vld [vmem:[#allocation2 + $0x1e8] sm:$0xff]  }
  0x25   :  { %953 = vmatpush3.bf16.msra.mxu0 %v1074_v18  ;;  %v1106_v58 = vld [vmem:[#allocation2 + $0x120] sm:$0xff]   ;;  %v1110_v62 = vld [vmem:[#allocation2 + $0x128] sm:$0xff]   ;;  %v1112_v0 = vld [vmem:[#allocation2 + $0x170] sm:$0xff]  }
  0x26   :  { %975 = vmatpush3.bf16.msra.mxu1 %v1075_v19  ;;  %954 = vmatprep.subr.bf16.mxu0 %v1076_v20  ;;  %v1107_v59 = vld [vmem:[#allocation2 + $0x1a0] sm:$0xff]   ;;  %v1111_v63 = vld [vmem:[#allocation2 + $0x1a8] sm:$0xff]   ;;  %v1113_v1 = vld [vmem:[#allocation2 + $0x1f0] sm:$0xff]  }
  0x27   :  { %976 = vmatprep.subr.bf16.mxu1 %v1077_v21  ;;  %v1114_v2 = vld [vmem:[#allocation2 + $0x130] sm:$0xff]   ;;  %v1116_v4 = vld [vmem:[#allocation2 + $0x178] sm:$0xff]   ;;  %v46_v8 = vld [vmem:[%s1249_s0 + $0x28] sm:$0xff] }
  0x28   :  { %v1115_v3 = vld [vmem:[#allocation2 + $0x1b0] sm:$0xff]   ;;  %v1117_v5 = vld [vmem:[#allocation2 + $0x1f8] sm:$0xff]   ;;  %v54_v10 = vpack.c.bf16 %v46_v8, %v46_v8  ;;  %v45_v12 = vld [vmem:[%s1249_s0 + $0x20] sm:$0xff] }
  0x29   :  { %955 = vmatpush3.bf16.msra.mxu0 %v1078_v22  ;;  %v1118_v6 = vld [vmem:[#allocation2 + $0x138] sm:$0xff]   ;;  %v47_v13 = vld [vmem:[%s1249_s0 + $0x30] sm:$0xff]  ;;  %v53_v14 = vpack.c.bf16 %v45_v12, %v45_v12  ;;  %v1120_v16 = vld [vmem:[%s1252_s3] sm:$0xff]  }
  0x2a   :  { %977 = vmatpush3.bf16.msra.mxu1 %v1079_v23  ;;  %956 = vmatprep.subr.bf16.mxu0 %v1080_v24  ;;  %v1119_v7 = vld [vmem:[#allocation2 + $0x1b8] sm:$0xff]   ;;  %v55_v15 = vpack.c.bf16 %v47_v13, %v47_v13  ;;  %v1121_v18 = vld [vmem:[%s1252_s3 + $0x8] sm:$0xff]   ;;  %v1122_v19 = vld [vmem:[%s1254_s5] sm:$0xff]  }
  0x2b   :  { %978 = vmatprep.subr.bf16.mxu1 %v1081_v25  ;;  %v48_v9 = vld [vmem:[%s1249_s0 + $0x38] sm:$0xff]  ;;  %v872_v22 = vld [vmem:[%s1251_s2] ss:$0 sm:$0xff] }
  0x2c   :  { %v56_v11 = vpack.c.bf16 %v48_v9, %v48_v9 }
  0x2d   :  { %957 = vmatpush3.bf16.msra.mxu0 %v1082_v26 }
  0x2e   :  { %979 = vmatpush3.bf16.msra.mxu1 %v1083_v27  ;;  %958 = vmatprep.subr.bf16.mxu0 %v1084_v28 }
  0x2f   :  { %980 = vmatprep.subr.bf16.mxu1 %v1085_v29 }
  0x31   :  { %959 = vmatpush3.bf16.msra.mxu0 %v1086_v30 }
  0x32   :  { %981 = vmatpush3.bf16.msra.mxu1 %v1087_v31  ;;  %988 = vmatprep.subr.bf16.mxu0 %v1088_v40 }
  0x33   :  { %1010 = vmatprep.subr.bf16.mxu1 %v1089_v41 }
  0x34   :  { %609 = vmatmul.mubr.bf16.vlgmr.msra.gmra.mrb[0].mxu0 %v49_v37 }
  0x35   :  { %649 = vmatmul.mubr.bf16.vlgmr.msra.gmra.mrb[0].mxu1 %v51_v39  ;;  %989 = vmatpush3.bf16.msra.mxu0 %v1090_v42 }
  0x36   :  { %1011 = vmatpush3.bf16.msra.mxu1 %v1091_v43  ;;  %990 = vmatprep.subr.bf16.mxu0 %v1092_v44 }
  0x37   :  { %1012 = vmatprep.subr.bf16.mxu1 %v1093_v45  ;;  %688 = vmatprep.mubr.bf16.mxu0 %v54_v10 }
  0x38   :  { %728 = vmatprep.mubr.bf16.mxu1 %v56_v11 }
  0x39   :  { %991 = vmatpush3.bf16.msra.mxu0 %v1094_v46 }
  0x3a   :  { %1013 = vmatpush3.bf16.msra.mxu1 %v1095_v47  ;;  %992 = vmatprep.subr.bf16.mxu0 %v1096_v48  ;;  %v937_v47 = vld [vmem:[%s1253_s4] ss:$0 sm:$0xff] }
  0x3b   :  { %1014 = vmatprep.subr.bf16.mxu1 %v1097_v49 }
  0x3d   :  { %993 = vmatpush3.bf16.msra.mxu0 %v1098_v50 }
  0x3e   :  { %1015 = vmatpush3.bf16.msra.mxu1 %v1099_v51  ;;  %994 = vmatprep.subr.bf16.mxu0 %v1100_v52 }
  0x3f   :  { %1016 = vmatprep.subr.bf16.mxu1 %v1101_v53 }
  0x41   :  { %995 = vmatpush3.bf16.msra.mxu0 %v1102_v54 }
  0x42   :  { %1017 = vmatpush3.bf16.msra.mxu1 %v1103_v55  ;;  %996 = vmatprep.subr.bf16.mxu0 %v1104_v56  ;;  %v941_v55 = vld [vmem:[%s1255_s6] ss:$0 sm:$0xff] }
  0x43   :  { %1018 = vmatprep.subr.bf16.mxu1 %v1105_v57 }
  0x45   :  { %997 = vmatpush3.bf16.msra.mxu0 %v1106_v58 }
  0x46   :  { %1019 = vmatpush3.bf16.msra.mxu1 %v1107_v59  ;;  %998 = vmatprep.subr.bf16.mxu0 %v1108_v60 }
  0x47   :  { %1020 = vmatprep.subr.bf16.mxu1 %v1109_v61 }
  0x49   :  { %999 = vmatpush3.bf16.msra.mxu0 %v1110_v62 }
  0x4a   :  { %1021 = vmatpush3.bf16.msra.mxu1 %v1111_v63  ;;  %1000 = vmatprep.subr.bf16.mxu0 %v1112_v0 }
  0x4b   :  { %1022 = vmatprep.subr.bf16.mxu1 %v1113_v1 }
  0x4d   :  { %1001 = vmatpush3.bf16.msra.mxu0 %v1114_v2 }
  0x4e   :  { %1023 = vmatpush3.bf16.msra.mxu1 %v1115_v3  ;;  %1002 = vmatprep.subr.bf16.mxu0 %v1116_v4 }
  0x4f   :  { %1024 = vmatprep.subr.bf16.mxu1 %v1117_v5 }
  0x51   :  { %1003 = vmatpush3.bf16.msra.mxu0 %v1118_v6 }
  0x52   :  { %1025 = vmatpush3.bf16.msra.mxu1 %v1119_v7  ;;  %1037 = vmatprep.subr.bf16.mxu0 %v1150_v17 }
  0x53   :  { %1045 = vmatprep.subr.bf16.mxu1 %v1150_v17 }
  0x54   :  { %689 = vmatmul.mubr.bf16.vlgmr.msra.gmra.mrb[4].mxu0 %v53_v14 }
  0x55   :  { %729 = vmatmul.mubr.bf16.vlgmr.msra.gmra.mrb[4].mxu1 %v55_v15  ;;  %1038 = vmatpush3.bf16.msra.mxu0 %v1120_v16 }
  0x56   :  { %1039 = vmatprep.subr.bf16.mxu0 %v1150_v17  ;;  %1041 = vmatprep.mubr.msk.bf16.mxu0 %vm1151_vm0, %v1150_v17 }
  0x57   :  { %1047 = vmatprep.mubr.msk.bf16.mxu1 %vm1151_vm0, %v1150_v17  ;;  %1046 = vmatpush3.bf16.msra.mxu1 %v1122_v19 }
  0x59   :  { %1040 = vmatpush3.bf16.msra.mxu0 %v1121_v18 }
 0x107   :  { %v960_v20 = vpop.f32.mrb[0].mxu0 }
 0x108   :  { %v982_v21 = vpop.f32.mrb[0].mxu1  ;;  %v961_v23 = vpop.f32.mrb[1].mxu0 }
 0x109   :  { %v983_v24 = vpop.f32.mrb[1].mxu1  ;;  %v962_v25 = vadd.f32 %v961_v23, %v960_v20  ;;  %v963_v27 = vpop.f32.mrb[2].mxu0 }
 0x10a   :  { %v984_v26 = vadd.f32 %v983_v24, %v982_v21  ;;  %v985_v28 = vpop.f32.mrb[2].mxu1  ;;  %v964_v29 = vpop.f32.mrb[3].mxu0 }
 0x10b   :  { %v986_v30 = vpop.f32.mrb[3].mxu1  ;;  %v611_v31 = vadd.f32 %v962_v25, %v872_v22 }
 0x10d   :  { %v651_v32 = vadd.f32 %v984_v26, %v611_v31 }
 0x127   :  { %v1004_v33 = vpop.f32.mrb[4].mxu0 }
 0x128   :  { %v1026_v34 = vpop.f32.mrb[4].mxu1  ;;  %v1005_v35 = vpop.f32.mrb[5].mxu0 }
 0x129   :  { %v1006_v36 = vadd.f32 %v1005_v35, %v1004_v33  ;;  %v1027_v37 = vpop.f32.mrb[5].mxu1  ;;  %v1007_v38 = vpop.f32.mrb[6].mxu0 }
 0x12a   :  { %v1028_v39 = vadd.f32 %v1027_v37, %v1026_v34  ;;  %v1029_v40 = vpop.f32.mrb[6].mxu1  ;;  %v1008_v41 = vpop.f32.mrb[7].mxu0 }
 0x12b   :  { %v691_v42 = vadd.f32 %v1006_v36, %v651_v32  ;;  %v1030_v43 = vpop.f32.mrb[7].mxu1 }
 0x12d   :  { %v731_v44 = vadd.f32 %v1028_v39, %v691_v42 }
 0x12f   :  { %v736_v45 = vmax.f32 %v731_v44, 0.0 }
 0x131   :  { %v737_v46 = vpack.c.bf16 %v736_v45, %v736_v45 }
 0x133   :  { %1042 = vmatmul.mubr.msk.bf16.vlgmr.msra.gmra.mrb[8].mxu0 %vm761_vm1, %v737_v46 }
 0x206   :  { %v799_v48 = vpop.f32.mrb[8].mxu0 }
 0x207   :  { %v800_v49 = vadd.f32 %v937_v47, %v799_v48  ;;  %v1043_v50 = vpop.f32.mrb[9].mxu0 }
 0x208   :  { %v802_v51 = vpop.f32.mrb[10].mxu0 }
 0x209   :  { %v805_v52 = vmax.f32 %v800_v49, 0.0  ;;  %v1044_v53 = vpop.f32.mrb[11].mxu0 }
 0x20b   :  { %v806_v54 = vpack.c.bf16 %v805_v52, %v805_v52 }
 0x20d   :  { %1048 = vmatmul.mubr.msk.bf16.vlgmr.msra.gmra.mrb[8].mxu1 %vm822_vm2, %v806_v54 }
 0x2e0   :  { %v860_v56 = vpop.f32.mrb[8].mxu1 }
 0x2e1   :  { %v861_v57 = vadd.f32 %v941_v55, %v860_v56  ;;  %v1049_v58 = vpop.f32.mrb[9].mxu1 }
 0x2e2   :  { %v863_v59 = vpop.f32.mrb[10].mxu1 }
 0x2e3   :  { %866 = vst [vmem:[%s1256_s7] sm:$0xff] %v861_v57  ;;  %v1050_v60 = vpop.f32.mrb[11].mxu1 }
 0x2e4   :  { %871 = vsyncpa [#allocation3], 1 }

</bundles_post_ra>
